<compile_context>
chip_gen: v7x
topology: tpu7x:2x2x1
jax: 0.10.0
libtpu: 0.0.40
codegen_flags: <defaults>
</compile_context>

<pallas_src>
import jax
import jax.numpy as jnp
from jax.experimental import pallas as pl
from jax.experimental.pallas import tpu as pltpu


def _critic_kernel(obs_ref, act_ref, w1o_ref, w1a_ref, b1_ref,
                   w2_ref, b2_ref, w3_ref, b3_ref, q_ref):
    # fc1 (concat fused as a split matmul) + ReLU, f32 accumulation.
    h1 = (jnp.dot(obs_ref[...], w1o_ref[...], preferred_element_type=jnp.float32)
          + jnp.dot(act_ref[...], w1a_ref[...], preferred_element_type=jnp.float32)
          + b1_ref[...])
    h1 = jnp.maximum(h1, 0.0).astype(w2_ref.dtype)

    # fc2 + ReLU
    h2 = jnp.dot(h1, w2_ref[...], preferred_element_type=jnp.float32) + b2_ref[...]
    h2 = jnp.maximum(h2, 0.0).astype(w3_ref.dtype)

    # fc3 (no activation) -> q
    q = jnp.dot(h2, w3_ref[...], preferred_element_type=jnp.float32) + b3_ref[...]
    q_ref[...] = q.astype(q_ref.dtype)


def _round_up(x, m):
    return (x + m - 1) // m * m


def critic_forward(obs, act, params, *, block_rows=512,
                   compute_dtype=jnp.bfloat16):
    """Pallas implementation of Critic.forward(obs, act).

    params = (w1, b1, w2, b2, w3, b3) with weights stored transposed vs.
    PyTorch (shape (in, out)) and biases shaped (1, out).
    """
    w1, b1, w2, b2, w3, b3 = params
    obs_dim = obs.shape[-1]
    act_dim = act.shape[-1]
    hidden = w1.shape[-1]
    batch = obs.shape[0]
    in1 = obs_dim + act_dim

    # Split fc1's weight so concat([obs, act]) never materializes in HBM:
    #   x @ w1  ==  obs @ w1[:obs_dim] + act @ w1[obs_dim:]
    w1o, w1a = w1[:obs_dim], w1[obs_dim:]

    cd = jnp.dtype(compute_dtype)
    obs_c = obs.astype(cd)
    act_c = act.astype(cd)
    w1o_c = w1o.astype(cd)
    w1a_c = w1a.astype(cd)
    w2_c = w2.astype(cd)
    w3_c = w3.astype(cd)
    b1_f = b1.astype(jnp.float32)
    b2_f = b2.astype(jnp.float32)
    b3_f = b3.astype(jnp.float32)

    # Batch tiling: tm rows per grid step (multiple of 8); pad the batch up to
    # a whole number of tiles so every block is fully valid (pad rows produce
    # finite garbage that is sliced away at the end).
    tm = min(block_rows, _round_up(batch, 8))
    tm = _round_up(tm, 8)
    padded = _round_up(batch, tm)
    if padded != batch:
        pad = padded - batch
        obs_c = jnp.pad(obs_c, ((0, pad), (0, 0)))
        act_c = jnp.pad(act_c, ((0, pad), (0, 0)))
    grid = (padded // tm,)

    # Advisory cost estimate for XLA's scheduler.
    flops = 2 * padded * (in1 * hidden + hidden * hidden + hidden)
    bytes_accessed = (
        padded * in1 * cd.itemsize                       # obs + act tiles
        + (in1 * hidden + hidden * hidden + hidden) * cd.itemsize  # weights
        + (2 * hidden + 1) * 4                           # biases (f32)
        + padded * 4                                     # q output (f32)
    )
    cost = pl.CostEstimate(flops=flops, transcendentals=0,
                           bytes_accessed=bytes_accessed)

    row = lambda i: (i, 0)     # batch-tiled operands
    const = lambda i: (0, 0)   # weights/biases: resident across the grid

    q = pl.pallas_call(
        _critic_kernel,
        out_shape=jax.ShapeDtypeStruct((padded, 1), jnp.float32),
        grid=grid,
        in_specs=[
            pl.BlockSpec((tm, obs_dim), row),        # obs tile
            pl.BlockSpec((tm, act_dim), row),        # act tile
            pl.BlockSpec((obs_dim, hidden), const),  # w1[:obs_dim]
            pl.BlockSpec((act_dim, hidden), const),  # w1[obs_dim:]
            pl.BlockSpec((1, hidden), const),        # b1
            pl.BlockSpec((hidden, hidden), const),   # w2
            pl.BlockSpec((1, hidden), const),        # b2
            pl.BlockSpec((hidden, 1), const),        # w3
            pl.BlockSpec((1, 1), const),             # b3
        ],
        out_specs=pl.BlockSpec((tm, 1), row),
        compiler_params=pltpu.CompilerParams(
            dimension_semantics=("parallel",),
        ),
        cost_estimate=cost,
    )(obs_c, act_c, w1o_c, w1a_c, b1_f, w2_c, b2_f, w3_c, b3_f)

    return q[:batch]


def init_critic_params(key, obs_dim, act_dim, hidden_dim):
    """Deterministic init matching PyTorch nn.Linear fan-in uniform init.

    Weights are stored transposed, shape (in, out); biases shaped (1, out).
    """
    in1 = obs_dim + act_dim
    k1, k2, k3, k4, k5, k6 = jax.random.split(key, 6)

    def u(k, shape, fan_in):
        bound = 1.0 / jnp.sqrt(jnp.float32(fan_in))
        return jax.random.uniform(k, shape, jnp.float32, -bound, bound)

    w1 = u(k1, (in1, hidden_dim), in1)
    b1 = u(k2, (1, hidden_dim), in1)
    w2 = u(k3, (hidden_dim, hidden_dim), hidden_dim)
    b2 = u(k4, (1, hidden_dim), hidden_dim)
    w3 = u(k5, (hidden_dim, 1), hidden_dim)
    b3 = u(k6, (1, 1), hidden_dim)
    return (w1, b1, w2, b2, w3, b3)


def critic_reference(obs, act, params, compute_dtype=jnp.float32):
    """Pure-JAX reference; compute_dtype mirrors the kernel's MXU input dtype."""
    w1, b1, w2, b2, w3, b3 = params
    cd = jnp.dtype(compute_dtype)
    x = jnp.concatenate([obs.astype(cd), act.astype(cd)], axis=-1)
    h1 = jax.nn.relu(
        jnp.dot(x, w1.astype(cd), preferred_element_type=jnp.float32) + b1)
    h2 = jax.nn.relu(
        jnp.dot(h1.astype(cd), w2.astype(cd),
                preferred_element_type=jnp.float32) + b2)
    q = jnp.dot(h2.astype(cd), w3.astype(cd),
                preferred_element_type=jnp.float32) + b3
    return q


if __name__ == "__main__":
    obs_dim, act_dim, hidden_dim = 16, 8, 32
    batch = 64

    key = jax.random.PRNGKey(0)
    k_obs, k_act, k_params = jax.random.split(key, 3)

    obs = jax.random.normal(k_obs, (batch, obs_dim), jnp.float32)
    act = jax.random.normal(k_act, (batch, act_dim), jnp.float32)
    params = init_critic_params(k_params, obs_dim, act_dim, hidden_dim)

    # bf16-input path (default), small block_rows to exercise a multi-step grid.
    q_bf16 = critic_forward(obs, act, params, block_rows=16,
                            compute_dtype=jnp.bfloat16)
    q_bf16 = jax.block_until_ready(q_bf16)

    # f32 path (bit-faithful to the original module's numerics).
    q_f32 = critic_forward(obs, act, params, block_rows=16,
                           compute_dtype=jnp.float32)
    q_f32 = jax.block_until_ready(q_f32)

    ref_f32 = critic_reference(obs, act, params, compute_dtype=jnp.float32)
    ref_bf16 = critic_reference(obs, act, params, compute_dtype=jnp.bfloat16)

    assert q_bf16.shape == (batch, 1), q_bf16.shape
    assert q_f32.shape == (batch, 1), q_f32.shape
    # f32 kernel vs f32 reference: tight.
    assert jnp.allclose(q_f32, ref_f32, atol=1e-4, rtol=1e-4), (q_f32, ref_f32)
    # bf16 kernel vs matching-precision reference: tight.
    assert jnp.allclose(q_bf16, ref_bf16, atol=1e-3, rtol=1e-3), (q_bf16, ref_bf16)
    # bf16 kernel vs full-f32 reference: loosened tolerance (bf16 MXU inputs).
    assert jnp.allclose(q_bf16, ref_f32, atol=5e-2, rtol=5e-2), (q_bf16, ref_f32)

    print("KERNEL_OK")
</pallas_src>

<mosaic_0001>
module attributes {stable_mosaic.version = 11 : i64} {
  func.func @_critic_kernel(%arg0: i32, %arg1: memref<16x16xbf16, #tpu.memory_space<vmem>>, %arg2: memref<16x8xbf16, #tpu.memory_space<vmem>>, %arg3: memref<16x32xbf16, #tpu.memory_space<vmem>>, %arg4: memref<8x32xbf16, #tpu.memory_space<vmem>>, %arg5: memref<1x32xf32, #tpu.memory_space<vmem>>, %arg6: memref<32x32xbf16, #tpu.memory_space<vmem>>, %arg7: memref<1x32xf32, #tpu.memory_space<vmem>>, %arg8: memref<32x1xbf16, #tpu.memory_space<vmem>>, %arg9: memref<1x1xf32, #tpu.memory_space<vmem>>, %arg10: memref<16x1xf32, #tpu.memory_space<vmem>>) attributes {dimension_semantics = [#tpu.dimension_semantics<parallel>], iteration_bounds = array<i64: 4>, scalar_prefetch = 0 : i64, scratch_operands = 0 : i64, tpu.core_type = #tpu.core_type<tc>, window_params = [{transform_indices = @transform_0, window_bounds = array<i64: 16, 16>}, {transform_indices = @transform_1, window_bounds = array<i64: 16, 8>}, {pipeline_mode = #tpu.pipeline_mode<synchronous>, transform_indices = @transform_2, window_bounds = array<i64: 16, 32>}, {pipeline_mode = #tpu.pipeline_mode<synchronous>, transform_indices = @transform_3, window_bounds = array<i64: 8, 32>}, {pipeline_mode = #tpu.pipeline_mode<synchronous>, transform_indices = @transform_4, window_bounds = array<i64: 1, 32>}, {pipeline_mode = #tpu.pipeline_mode<synchronous>, transform_indices = @transform_5, window_bounds = array<i64: 32, 32>}, {pipeline_mode = #tpu.pipeline_mode<synchronous>, transform_indices = @transform_6, window_bounds = array<i64: 1, 32>}, {pipeline_mode = #tpu.pipeline_mode<synchronous>, transform_indices = @transform_7, window_bounds = array<i64: 32, 1>}, {pipeline_mode = #tpu.pipeline_mode<synchronous>, transform_indices = @transform_8, window_bounds = array<i64: 1, 1>}, {transform_indices = @transform_9, window_bounds = array<i64: 16, 1>}]} {
    %c0 = arith.constant 0 : index
    %c0_0 = arith.constant 0 : index
    %0 = vector.load %arg1[%c0, %c0_0] : memref<16x16xbf16, #tpu.memory_space<vmem>>, vector<16x16xbf16>
    %c0_1 = arith.constant 0 : index
    %c0_2 = arith.constant 0 : index
    %1 = vector.load %arg3[%c0_1, %c0_2] : memref<16x32xbf16, #tpu.memory_space<vmem>>, vector<16x32xbf16>
    %cst = arith.constant dense<0.000000e+00> : vector<16x32xf32>
    %2 = tpu.matmul %0, %1, %cst {dimension_numbers = #tpu.dot_dimension_numbers<[1], [0], [0], [1], [0, 0, 1, 1], [], []>} : vector<16x16xbf16>, vector<16x32xbf16>, vector<16x32xf32> -> vector<16x32xf32>
    %c0_3 = arith.constant 0 : index
    %c0_4 = arith.constant 0 : index
    %3 = vector.load %arg2[%c0_3, %c0_4] : memref<16x8xbf16, #tpu.memory_space<vmem>>, vector<16x8xbf16>
    %c0_5 = arith.constant 0 : index
    %c0_6 = arith.constant 0 : index
    %4 = vector.load %arg4[%c0_5, %c0_6] : memref<8x32xbf16, #tpu.memory_space<vmem>>, vector<8x32xbf16>
    %cst_7 = arith.constant dense<0.000000e+00> : vector<16x32xf32>
    %5 = tpu.matmul %3, %4, %cst_7 {dimension_numbers = #tpu.dot_dimension_numbers<[1], [0], [0], [1], [0, 0, 1, 1], [], []>} : vector<16x8xbf16>, vector<8x32xbf16>, vector<16x32xf32> -> vector<16x32xf32>
    %6 = arith.addf %2, %5 : vector<16x32xf32>
    %c0_8 = arith.constant 0 : index
    %c0_9 = arith.constant 0 : index
    %7 = vector.load %arg5[%c0_8, %c0_9] : memref<1x32xf32, #tpu.memory_space<vmem>>, vector<1x32xf32>
    %8 = vector.broadcast %7 : vector<1x32xf32> to vector<16x32xf32>
    %9 = arith.addf %6, %8 : vector<16x32xf32>
    %cst_10 = arith.constant 0.000000e+00 : f32
    %10 = vector.broadcast %cst_10 : f32 to vector<16x32xf32>
    %11 = arith.maximumf %9, %10 : vector<16x32xf32>
    %12 = arith.truncf %11 : vector<16x32xf32> to vector<16x32xbf16>
    %c0_11 = arith.constant 0 : index
    %c0_12 = arith.constant 0 : index
    %13 = vector.load %arg6[%c0_11, %c0_12] : memref<32x32xbf16, #tpu.memory_space<vmem>>, vector<32x32xbf16>
    %cst_13 = arith.constant dense<0.000000e+00> : vector<16x32xf32>
    %14 = tpu.matmul %12, %13, %cst_13 {dimension_numbers = #tpu.dot_dimension_numbers<[1], [0], [0], [1], [0, 0, 1, 1], [], []>} : vector<16x32xbf16>, vector<32x32xbf16>, vector<16x32xf32> -> vector<16x32xf32>
    %c0_14 = arith.constant 0 : index
    %c0_15 = arith.constant 0 : index
    %15 = vector.load %arg7[%c0_14, %c0_15] : memref<1x32xf32, #tpu.memory_space<vmem>>, vector<1x32xf32>
    %16 = vector.broadcast %15 : vector<1x32xf32> to vector<16x32xf32>
    %17 = arith.addf %14, %16 : vector<16x32xf32>
    %cst_16 = arith.constant 0.000000e+00 : f32
    %18 = vector.broadcast %cst_16 : f32 to vector<16x32xf32>
    %19 = arith.maximumf %17, %18 : vector<16x32xf32>
    %20 = arith.truncf %19 : vector<16x32xf32> to vector<16x32xbf16>
    %c0_17 = arith.constant 0 : index
    %c0_18 = arith.constant 0 : index
    %21 = vector.load %arg8[%c0_17, %c0_18] : memref<32x1xbf16, #tpu.memory_space<vmem>>, vector<32x1xbf16>
    %cst_19 = arith.constant dense<0.000000e+00> : vector<16x1xf32>
    %22 = tpu.matmul %20, %21, %cst_19 {dimension_numbers = #tpu.dot_dimension_numbers<[1], [0], [0], [1], [0, 0, 1, 1], [], []>} : vector<16x32xbf16>, vector<32x1xbf16>, vector<16x1xf32> -> vector<16x1xf32>
    %c0_20 = arith.constant 0 : index
    %c0_21 = arith.constant 0 : index
    %23 = vector.load %arg9[%c0_20, %c0_21] : memref<1x1xf32, #tpu.memory_space<vmem>>, vector<1x1xf32>
    %24 = vector.broadcast %23 : vector<1x1xf32> to vector<16x1xf32>
    %25 = arith.addf %22, %24 : vector<16x1xf32>
    %c0_22 = arith.constant 0 : index
    %c0_23 = arith.constant 0 : index
    %26 = vector.load %arg10[%c0_22, %c0_23] : memref<16x1xf32, #tpu.memory_space<vmem>>, vector<16x1xf32>
    tpu.vector_store %arg10[%c0_22, %c0_23], %25 {strides = array<i32>} : memref<16x1xf32, #tpu.memory_space<vmem>>, vector<16x1xf32>,
    return
  }
  func.func @transform_0(%arg0: i32) -> (i32, i32) {
    %c0_i32 = arith.constant 0 : i32
    %c0_i32_0 = arith.constant 0 : i32
    return %arg0, %c0_i32 : i32, i32
  }
  func.func @transform_1(%arg0: i32) -> (i32, i32) {
    %c0_i32 = arith.constant 0 : i32
    %c0_i32_0 = arith.constant 0 : i32
    return %arg0, %c0_i32 : i32, i32
  }
  func.func @transform_2(%arg0: i32) -> (i32, i32) {
    %c0_i32 = arith.constant 0 : i32
    %c0_i32_0 = arith.constant 0 : i32
    %c0_i32_1 = arith.constant 0 : i32
    return %c0_i32, %c0_i32_0 : i32, i32
  }
  func.func @transform_3(%arg0: i32) -> (i32, i32) {
    %c0_i32 = arith.constant 0 : i32
    %c0_i32_0 = arith.constant 0 : i32
    %c0_i32_1 = arith.constant 0 : i32
    return %c0_i32, %c0_i32_0 : i32, i32
  }
  func.func @transform_4(%arg0: i32) -> (i32, i32) {
    %c0_i32 = arith.constant 0 : i32
    %c0_i32_0 = arith.constant 0 : i32
    %c0_i32_1 = arith.constant 0 : i32
    return %c0_i32, %c0_i32_0 : i32, i32
  }
  func.func @transform_5(%arg0: i32) -> (i32, i32) {
    %c0_i32 = arith.constant 0 : i32
    %c0_i32_0 = arith.constant 0 : i32
    %c0_i32_1 = arith.constant 0 : i32
    return %c0_i32, %c0_i32_0 : i32, i32
  }
  func.func @transform_6(%arg0: i32) -> (i32, i32) {
    %c0_i32 = arith.constant 0 : i32
    %c0_i32_0 = arith.constant 0 : i32
    %c0_i32_1 = arith.constant 0 : i32
    return %c0_i32, %c0_i32_0 : i32, i32
  }
  func.func @transform_7(%arg0: i32) -> (i32, i32) {
    %c0_i32 = arith.constant 0 : i32
    %c0_i32_0 = arith.constant 0 : i32
    %c0_i32_1 = arith.constant 0 : i32
    return %c0_i32, %c0_i32_0 : i32, i32
  }
  func.func @transform_8(%arg0: i32) -> (i32, i32) {
    %c0_i32 = arith.constant 0 : i32
    %c0_i32_0 = arith.constant 0 : i32
    %c0_i32_1 = arith.constant 0 : i32
    return %c0_i32, %c0_i32_0 : i32, i32
  }
  func.func @transform_9(%arg0: i32) -> (i32, i32) {
    %c0_i32 = arith.constant 0 : i32
    %c0_i32_0 = arith.constant 0 : i32
    return %arg0, %c0_i32 : i32, i32
  }
}

</mosaic_0001>

<bundles_post_ra>
// kernel: tpu_custom_call.1
= control target key start
LH: loop header
LB: loop body
LE: loop exit
PB: predicated region body
PF: predicated region fallthrough
CT: control target
= control target key end

     0   :  { %s844_s11 = smov 0   ;;  %s898_s0 = inlined_call_operand.vmem [shape: bf16[64,16], index: 0, kind: input, shape index: {}]   ;;  %s899_s1 = inlined_call_operand.vmem [shape: bf16[64,8], index: 1, kind: input, shape index: {}]   ;;  %s900_s2 = inlined_call_operand.vmem [shape: bf16[16,32], index: 2, kind: input, shape index: {}]   ;;  %s901_s3 = inlined_call_operand.vmem [shape: bf16[8,32], index: 3, kind: input, shape index: {}]   ;;  %s902_s4 = inlined_call_operand.vmem [shape: f32[1,32], index: 4, kind: input, shape index: {}]   ;;  %s903_s5 = inlined_call_operand.vmem [shape: bf16[32,32], index: 5, kind: input, shape index: {}]   ;;  %s904_s6 = inlined_call_operand.vmem [shape: f32[1,32], index: 6, kind: input, shape index: {}]   ;;  %s905_s7 = inlined_call_operand.vmem [shape: bf16[32,1], index: 7, kind: input, shape index: {}]   ;;  %s906_s8 = inlined_call_operand.<no memory space> [shape: f32[1,1], index: 8, kind: input, shape index: {}]   ;;  %s907_s9 = inlined_call_operand.vmem [shape: f32[64,1], index: 9, kind: output, shape index: {}]  }
   0x1   :  { %v14_v0 = vstv %s906_s8 }
   0x2   :  { %15 = vst [vmem:[#allocation2] sm:$0x1] %v14_v0 }
   0x3 LB: > { %s699_s12 = sadd.s32 4294967295, %s787_s11   ;;  %p703_p0 = scmp.ge.s32.totalorder %s787_s11, 1  ;;  %s787_s11 = sphi %s844_s11, %s21_s11  }
   0x4   : > { %p301_p1 = scmp.lt.s32.totalorder %s787_s11, 5 }
   0x6   : > { %p302_p2 = pnand %p703_p0, %p301_p1 }
   0x7   : > { %v367_v1 = vld [vmem:[%s901_s3] sm:$0xf] (!%p302_p2)  ;;  %vm377_vm0 = vcmask (!%p302_p2), 1043456   ;;  %v789_v2 = vmov (!%p302_p2), 0.0   ;;  %s704_s16 = sshll.u32 (!%p302_p2), %s699_s12, 1  ;;  %vm790_vm1 = vmmov (!%p302_p2), 0  }
   0x8   : > { %305 = sbr.rel (%p302_p2) target bundleno = 679 (0x2a7), region = 56  ;;  %736 = vmatprep.subr.bf16.mxu0 (!%p302_p2), %v789_v2  ;;  %742 = vmatprep.subr.bf16.mxu1 (!%p302_p2), %v789_v2  ;;  %v379_v3 = vsel (!%p302_p2), %vm377_vm0, %v367_v1, 0  ;;  %v774_v4 = vld [vmem:[%s900_s2] sm:$0xff] (!%p302_p2)   ;;  %p343_p3 = scmp.lt.s32.totalorder (!%p302_p2), %s704_s16, 7  ;;  %vm373_vm2 = vcmask (!%p302_p2), 64512   ;;  %vm433_vm3 = vcmask (!%p302_p2), 130048  }
   0x9   : > { %737 = vmatpush3.bf16.msra.mxu0 (!%p302_p2), %v379_v3  ;;  %738 = vmatprep.mubr.msk.bf16.mxu0 (!%p302_p2), %vm790_vm1, %v789_v2  ;;  %v777_v7 = vld [vmem:[%s903_s5] sm:$0xff] (!%p302_p2)   ;;  %v778_v8 = vld [vmem:[%s903_s5 + $0x8] sm:$0xff] (!%p302_p2)   ;;  %vm513_vm4 = vcmask (!%p302_p2), 261120   ;;  %vm628_vm5 = vcmask (!%p302_p2), 7168  }
   0xa   : > { %743 = vmatpush3.bf16.msra.mxu1 (!%p302_p2), %v774_v4  ;;  %744 = vmatprep.mubr.msk.bf16.mxu1 (!%p302_p2), %vm790_vm1, %v789_v2  ;;  %v715_v11 = vld [vmem:[%s902_s4] ss:$0 sm:$0xff] (!%p302_p2)  ;;  %v780_v26 = vld [vmem:[%s905_s7 + $0x8] sm:$0xff] (!%p302_p2)  }
   0xb   : > { %748 = vmatprep.subr.bf16.mxu0 (!%p302_p2), %v789_v2  ;;  %756 = vmatprep.subr.bf16.mxu1 (!%p302_p2), %v789_v2  ;;  %v779_v25 = vld [vmem:[%s905_s7] sm:$0xff] (!%p302_p2)  }
   0xc   : > { %v716_v27 = vld [vmem:[%s904_s6] ss:$0 sm:$0xff] (!%p302_p2) }
   0xd   : > { %v720_v37 = vld [vmem:[#allocation2] ss:$0 sm:$0xff] (!%p302_p2) }
   0xf   : > { %s909_s16 = smov (!%p343_p3, %s704_s16), 7 }
  0x10   : > { %s705_s17 = sshll.u32 %s909_s16, 2  ;;  %s709_s15 = sshll.u32 %s909_s16, 3 }
  0x11   : > { %s352_s20 = scalar_lea.vmem %s899_s1, %s705_s17  ;;  %s346_s23 = scalar_lea.vmem %s898_s0, %s705_s17 }
  0x12   : > { %v775_v5 = vld [vmem:[%s352_s20] sm:$0xff]   ;;  %s358_s19 = scalar_lea.vmem %s907_s9, %s709_s15 }
  0x13   : > { %v776_v6 = vld [vmem:[%s346_s23] sm:$0xff]   ;;  %739 = vmatmul.mubr.msk.bf16.vlgmr.msra.gmra.mrb[0].mxu0 %vm373_vm2, %v775_v5 }
  0x14   : > { %745 = vmatmul.mubr.msk.bf16.vlgmr.msra.gmra.mrb[0].mxu1 %vm433_vm3, %v776_v6  ;;  %752 = vmatprep.mubr.msk.bf16.mxu0 %vm790_vm1, %v789_v2 }
  0x15   : > { %760 = vmatprep.mubr.msk.bf16.mxu1 %vm790_vm1, %v789_v2  ;;  %749 = vmatpush3.bf16.msra.mxu0 %v777_v7 }
  0x16   : > { %750 = vmatprep.subr.bf16.mxu0 %v789_v2  ;;  %757 = vmatpush3.bf16.msra.mxu1 %v779_v25 }
  0x17   : > { %758 = vmatprep.subr.bf16.mxu1 %v789_v2 }
  0x19   : > { %751 = vmatpush3.bf16.msra.mxu0 %v778_v8 }
  0x1a   : > { %759 = vmatpush3.bf16.msra.mxu1 %v780_v26 }
  0xe6   : > { %v415_v9 = vpop.f32.mrb[0].mxu0 }
  0xe7   : > { %v471_v10 = vpop.f32.mrb[0].mxu1  ;;  %v740_v12 = vpop.f32.mrb[1].mxu0 }
  0xe8   : > { %v472_v13 = vadd.f32 %v471_v10, %v415_v9  ;;  %v746_v14 = vpop.f32.mrb[1].mxu1  ;;  %v418_v15 = vpop.f32.mrb[2].mxu0 }
  0xe9   : > { %v474_v16 = vpop.f32.mrb[2].mxu1  ;;  %v741_v17 = vpop.f32.mrb[3].mxu0 }
  0xea   : > { %v485_v18 = vadd.f32 %v715_v11, %v472_v13  ;;  %v475_v19 = vadd.f32 %v474_v16, %v418_v15  ;;  %v747_v20 = vpop.f32.mrb[3].mxu1 }
  0xec   : > { %v486_v21 = vadd.f32 %v715_v11, %v475_v19  ;;  %v487_v22 = vmax.f32 %v485_v18, 0.0 }
  0xee   : > { %v488_v23 = vmax.f32 %v486_v21, 0.0 }
  0xf0   : > { %v489_v24 = vpack.c.bf16 %v488_v23, %v487_v22 }
  0xf2   : > { %753 = vmatmul.mubr.msk.bf16.vlgmr.msra.gmra.mrb[4].mxu0 %vm513_vm4, %v489_v24 }
 0x1c5   : > { %v551_v28 = vpop.f32.mrb[4].mxu0 }
 0x1c6   : > { %v552_v29 = vadd.f32 %v716_v27, %v551_v28  ;;  %v754_v30 = vpop.f32.mrb[5].mxu0 }
 0x1c7   : > { %v554_v31 = vpop.f32.mrb[6].mxu0 }
 0x1c8   : > { %v555_v32 = vadd.f32 %v716_v27, %v554_v31  ;;  %v755_v33 = vpop.f32.mrb[7].mxu0  ;;  %v558_v34 = vmax.f32 %v552_v29, 0.0 }
 0x1ca   : > { %v559_v35 = vmax.f32 %v555_v32, 0.0 }
 0x1cc   : > { %v560_v36 = vpack.c.bf16 %v559_v35, %v558_v34 }
 0x1ce   : > { %761 = vmatmul.mubr.msk.bf16.vlgmr.msra.gmra.mrb[4].mxu1 %vm513_vm4, %v560_v36 }
 0x2a1   : > { %v621_v38 = vpop.f32.mrb[4].mxu1 }
 0x2a2   : > { %v622_v39 = vadd.f32 %v720_v37, %v621_v38  ;;  %v762_v40 = vpop.f32.mrb[5].mxu1 }
 0x2a3   : > { %v624_v41 = vpop.f32.mrb[6].mxu1 }
 0x2a4   : > { %629 = vst.msk [vmem:[%s358_s19] sm:$0xff] %vm628_vm5, %v622_v39  ;;  %v625_v42 = vadd.f32 %v720_v37, %v624_v41  ;;  %v763_v43 = vpop.f32.mrb[7].mxu1 }
 0x2a6   : > { %630 = vst.msk [vmem:[%s358_s19 + $0x8] sm:$0xff] %vm628_vm5, %v625_v42 }
 0x2a7 PF: > { %s21_s11 = sadd.s32 1, %s787_s11  }
 0x2a8   : > { %p18_p4 = scmp.ge.s32.totalorder %s21_s11, 6  }
 0x2aa   :  { %20 = sbr.rel (!%p18_p4) target bundleno = 3 (0x3), region = 89 }

</bundles_post_ra>
